<compile_context>
chip_gen: v7x
topology: tpu7x:2x2x1
jax: 0.10.0
libtpu: 0.0.40
codegen_flags: <defaults>
</compile_context>

<pallas_src>
import functools

import jax
import jax.numpy as jnp
from jax import lax
from jax.experimental import pallas as pl
from jax.experimental.pallas import tpu as pltpu

_NEG = -1e30  # finite "-inf": avoids inf - inf NaNs in the online update


def _round_up(x, m):
    return (x + m - 1) // m * m


def _contrastive_kernel(pred_ref, true_col_ref, true_row_ref, out_ref,
                        m_sc, l_sc, d_sc, *, bs, tile, n_col):
    i = pl.program_id(0)  # row tile of pred (parallel)
    j = pl.program_id(1)  # column tile of true (arbitrary / reduction)

    @pl.when(j == 0)
    def _init():
        m_sc[...] = jnp.full_like(m_sc, _NEG)
        l_sc[...] = jnp.zeros_like(l_sc)
        # diag[r] = <pred[r], true[r]> via a row-wise dot on the row-aligned
        # true tile: only (tile, emb) elementwise work, no bs x bs mask.
        d_sc[...] = jnp.sum(
            pred_ref[...].astype(jnp.float32)
            * true_row_ref[...].astype(jnp.float32),
            axis=-1, keepdims=True)

    # sim tile: (tile, tile). Contract dim 1 of both operands -> transposed-RHS
    # matmul on the MXU, native-dtype inputs, f32 accumulation.
    sim = lax.dot_general(
        pred_ref[...], true_col_ref[...],
        dimension_numbers=(((1,), (1,)), ((), ())),
        preferred_element_type=jnp.float32)

    if bs % tile != 0:  # static check: mask zero-padded columns
        col = j * tile + lax.broadcasted_iota(jnp.int32, sim.shape, 1)
        sim = jnp.where(col < bs, sim, _NEG)

    # Online logsumexp update; stats stay 2D (tile, 1).
    m_new = jnp.maximum(m_sc[...], jnp.max(sim, axis=-1, keepdims=True))
    alpha = jnp.exp(m_sc[...] - m_new)
    l_sc[...] = alpha * l_sc[...] + jnp.sum(jnp.exp(sim - m_new), axis=-1,
                                            keepdims=True)
    m_sc[...] = m_new

    @pl.when(j == n_col - 1)
    def _finalize():
        per = m_sc[...] + jnp.log(l_sc[...]) - d_sc[...]        # (tile, 1)
        if bs % tile != 0:  # zero padded rows so wrapper-side sums are exact
            row = i * tile + lax.broadcasted_iota(jnp.int32, per.shape, 0)
            per = jnp.where(row < bs, per, 0.0)
        out_ref[...] = per


@functools.partial(jax.jit, static_argnames=("reduction",))
def contrastive_pairwise_embedding_loss(embeddings_pred, embeddings_true,
                                        reduction="mean"):
    bs, emb = embeddings_pred.shape
    assert embeddings_true.shape == (bs, emb)

    # Tile choice: 256-aligned for large batches (v6e 2x256^2 MXU, also fine on
    # v5e's 4x128^2); for small batches a single sublane-aligned tile.
    tile = min(256, _round_up(bs, 8))
    bs_pad = _round_up(bs, tile)
    emb_pad = _round_up(emb, 128)  # lane alignment for the contraction dim
    n_row = bs_pad // tile
    n_col = bs_pad // tile

    def _pad(x):
        return jnp.pad(x, ((0, bs_pad - bs), (0, emb_pad - emb)))

    pred_p = _pad(embeddings_pred)
    true_p = _pad(embeddings_true)

    kernel = functools.partial(_contrastive_kernel,
                               bs=bs, tile=tile, n_col=n_col)

    # VMEM budget: 3 input tiles, double buffered, plus headroom. Capped at
    # 64 MiB so tile choices stay valid on v7x (64 MiB physical per TC).
    in_tile_bytes = tile * emb_pad * (pred_p.dtype.itemsize
                                      + 2 * true_p.dtype.itemsize)
    vmem_limit = int(min(max(4 * in_tile_bytes, 32 << 20), 64 << 20))

    cost = pl.CostEstimate(
        flops=2 * bs_pad * bs_pad * emb_pad + 2 * bs_pad * emb_pad,
        transcendentals=bs_pad * bs_pad + 2 * bs_pad,
        bytes_accessed=int(pred_p.nbytes + true_p.nbytes * (n_row + 1)
                           + bs_pad * 4),
    )

    per = pl.pallas_call(
        kernel,
        out_shape=jax.ShapeDtypeStruct((bs_pad, 1), jnp.float32),
        grid_spec=pltpu.PrefetchScalarGridSpec(
            num_scalar_prefetch=0,
            grid=(n_row, n_col),
            in_specs=[
                pl.BlockSpec((tile, emb_pad), lambda i, j: (i, 0)),  # pred rows
                pl.BlockSpec((tile, emb_pad), lambda i, j: (j, 0)),  # true cols
                pl.BlockSpec((tile, emb_pad), lambda i, j: (i, 0)),  # true rows (diag)
            ],
            out_specs=pl.BlockSpec((tile, 1), lambda i, j: (i, 0)),
            scratch_shapes=[
                pltpu.VMEM((tile, 1), jnp.float32),   # running row-max m
                pltpu.VMEM((tile, 1), jnp.float32),   # running row-sum l
                pltpu.VMEM((tile, 1), jnp.float32),   # diagonal <pred_i, true_i>
            ],
        ),
        compiler_params=pltpu.CompilerParams(
            dimension_semantics=("parallel", "arbitrary"),
            vmem_limit_bytes=vmem_limit,
        ),
        cost_estimate=cost,
    )(pred_p, true_p, true_p)

    per = per[:bs, 0]  # (bs,) valid per-sample losses (padded rows were zeroed)
    if reduction == "mean":
        return jnp.sum(per) / bs
    if reduction == "sum":
        return jnp.sum(per)
    return per  # 'none'


class ContrastivePairwiseEmbeddingLoss:
    """Pallas-backed equivalent of catalyst's ContrastivePairwiseEmbeddingLoss."""

    def __init__(self, margin=1.0, reduction="mean"):
        self.margin = margin  # unused in forward (matches the reference module)
        self.reduction = reduction or "none"

    def __call__(self, embeddings_pred, embeddings_true):
        return contrastive_pairwise_embedding_loss(
            embeddings_pred, embeddings_true, reduction=self.reduction)


def _reference(pred, true, reduction="mean"):
    sim = jnp.einsum("se,ae->sa", pred.astype(jnp.float32),
                     true.astype(jnp.float32))
    bs = pred.shape[0]
    logz = jax.scipy.special.logsumexp(sim, axis=-1)
    per = logz - sim[jnp.arange(bs), jnp.arange(bs)]
    if reduction == "mean":
        return jnp.mean(per)
    if reduction == "sum":
        return jnp.sum(per)
    return per


if __name__ == "__main__":
    key = jax.random.PRNGKey(0)
    k1, k2 = jax.random.split(key)

    bs, emb = 8, 32
    embeddings_pred = jax.random.normal(k1, (bs, emb), dtype=jnp.float32)
    embeddings_true = jax.random.normal(k2, (bs, emb), dtype=jnp.float32)

    # mean reduction
    loss_fn = ContrastivePairwiseEmbeddingLoss(margin=1.0, reduction="mean")
    loss = loss_fn(embeddings_pred, embeddings_true)
    jax.block_until_ready(loss)
    ref = _reference(embeddings_pred, embeddings_true, "mean")
    assert jnp.allclose(loss, ref, rtol=1e-5, atol=1e-5), (loss, ref)

    # per-sample ('none') reduction
    per = ContrastivePairwiseEmbeddingLoss(reduction="none")(
        embeddings_pred, embeddings_true)
    jax.block_until_ready(per)
    per_ref = _reference(embeddings_pred, embeddings_true, "none")
    assert per.shape == (bs,)
    assert jnp.allclose(per, per_ref, rtol=1e-5, atol=1e-5), (per, per_ref)

    print("KERNEL_OK")
</pallas_src>

<mosaic_0001>
module attributes {stable_mosaic.version = 11 : i64} {
  func.func @_contrastive_kernel(%arg0: i32, %arg1: i32, %arg2: memref<8x128xf32, #tpu.memory_space<vmem>>, %arg3: memref<8x128xf32, #tpu.memory_space<vmem>>, %arg4: memref<8x128xf32, #tpu.memory_space<vmem>>, %arg5: memref<8x1xf32, #tpu.memory_space<vmem>>, %arg6: memref<8x1xf32, #tpu.memory_space<vmem>>, %arg7: memref<8x1xf32, #tpu.memory_space<vmem>>, %arg8: memref<8x1xf32, #tpu.memory_space<vmem>>) attributes {dimension_semantics = [#tpu.dimension_semantics<parallel>, #tpu.dimension_semantics<arbitrary>], iteration_bounds = array<i64: 1, 1>, scalar_prefetch = 0 : i64, scratch_operands = 3 : i64, tpu.core_type = #tpu.core_type<tc>, window_params = [{transform_indices = @transform_0, window_bounds = array<i64: 8, 128>}, {transform_indices = @transform_1, window_bounds = array<i64: 8, 128>}, {transform_indices = @transform_2, window_bounds = array<i64: 8, 128>}, {transform_indices = @transform_3, window_bounds = array<i64: 8, 1>}]} {
    %c0_i32 = arith.constant 0 : i32
    %0 = arith.cmpi eq, %arg1, %c0_i32 : i32
    %1 = arith.extui %0 : i1 to i32
    %c0_i32_0 = arith.constant 0 : i32
    %2 = arith.cmpi ne, %1, %c0_i32_0 : i32
    scf.if %2 {
      %cst_18 = arith.constant -1.000000e+30 : f32
      %26 = vector.broadcast %cst_18 : f32 to vector<8x1xf32>
      %c0_19 = arith.constant 0 : index
      %c0_20 = arith.constant 0 : index
      %27 = vector.load %arg6[%c0_19, %c0_20] : memref<8x1xf32, #tpu.memory_space<vmem>>, vector<8x1xf32>
      tpu.vector_store %arg6[%c0_19, %c0_20], %26 {strides = array<i32>} : memref<8x1xf32, #tpu.memory_space<vmem>>, vector<8x1xf32>,
      %cst_21 = arith.constant 0.000000e+00 : f32
      %28 = vector.broadcast %cst_21 : f32 to vector<8x1xf32>
      %c0_22 = arith.constant 0 : index
      %c0_23 = arith.constant 0 : index
      %29 = vector.load %arg7[%c0_22, %c0_23] : memref<8x1xf32, #tpu.memory_space<vmem>>, vector<8x1xf32>
      tpu.vector_store %arg7[%c0_22, %c0_23], %28 {strides = array<i32>} : memref<8x1xf32, #tpu.memory_space<vmem>>, vector<8x1xf32>,
      %c0_24 = arith.constant 0 : index
      %c0_25 = arith.constant 0 : index
      %30 = vector.load %arg2[%c0_24, %c0_25] : memref<8x128xf32, #tpu.memory_space<vmem>>, vector<8x128xf32>
      %c0_26 = arith.constant 0 : index
      %c0_27 = arith.constant 0 : index
      %31 = vector.load %arg4[%c0_26, %c0_27] : memref<8x128xf32, #tpu.memory_space<vmem>>, vector<8x128xf32>
      %32 = arith.mulf %30, %31 : vector<8x128xf32>
      %cst_28 = arith.constant dense<0.000000e+00> : vector<8xf32>
      %33 = vector.multi_reduction <add>, %32, %cst_28 [1] : vector<8x128xf32> to vector<8xf32>
      %34 = vector.shape_cast %33 : vector<8xf32> to vector<8x1xf32>
      %c0_29 = arith.constant 0 : index
      %c0_30 = arith.constant 0 : index
      %35 = vector.load %arg8[%c0_29, %c0_30] : memref<8x1xf32, #tpu.memory_space<vmem>>, vector<8x1xf32>
      tpu.vector_store %arg8[%c0_29, %c0_30], %34 {strides = array<i32>} : memref<8x1xf32, #tpu.memory_space<vmem>>, vector<8x1xf32>,
    } else {
    }
    %c0 = arith.constant 0 : index
    %c0_1 = arith.constant 0 : index
    %3 = vector.load %arg2[%c0, %c0_1] : memref<8x128xf32, #tpu.memory_space<vmem>>, vector<8x128xf32>
    %c0_2 = arith.constant 0 : index
    %c0_3 = arith.constant 0 : index
    %4 = vector.load %arg3[%c0_2, %c0_3] : memref<8x128xf32, #tpu.memory_space<vmem>>, vector<8x128xf32>
    %cst = arith.constant dense<0.000000e+00> : vector<8x8xf32>
    %5 = tpu.matmul %3, %4, %cst {dimension_numbers = #tpu.dot_dimension_numbers<[1], [1], [0], [0], [0, 0, 1, 0], [], []>} : vector<8x128xf32>, vector<8x128xf32>, vector<8x8xf32> -> vector<8x8xf32>
    %c0_4 = arith.constant 0 : index
    %c0_5 = arith.constant 0 : index
    %6 = vector.load %arg6[%c0_4, %c0_5] : memref<8x1xf32, #tpu.memory_space<vmem>>, vector<8x1xf32>
    %cst_6 = arith.constant dense<0xFF800000> : vector<8xf32>
    %7 = vector.multi_reduction <maximumf>, %5, %cst_6 [1] : vector<8x8xf32> to vector<8xf32>
    %8 = vector.shape_cast %7 : vector<8xf32> to vector<8x1xf32>
    %9 = arith.maximumf %6, %8 : vector<8x1xf32>
    %c0_7 = arith.constant 0 : index
    %c0_8 = arith.constant 0 : index
    %10 = vector.load %arg6[%c0_7, %c0_8] : memref<8x1xf32, #tpu.memory_space<vmem>>, vector<8x1xf32>
    %11 = arith.subf %10, %9 : vector<8x1xf32>
    %12 = math.exp %11 : vector<8x1xf32>
    %c0_9 = arith.constant 0 : index
    %c0_10 = arith.constant 0 : index
    %13 = vector.load %arg7[%c0_9, %c0_10] : memref<8x1xf32, #tpu.memory_space<vmem>>, vector<8x1xf32>
    %14 = arith.mulf %12, %13 : vector<8x1xf32>
    %15 = vector.broadcast %9 : vector<8x1xf32> to vector<8x8xf32>
    %16 = arith.subf %5, %15 : vector<8x8xf32>
    %17 = math.exp %16 : vector<8x8xf32>
    %cst_11 = arith.constant dense<0.000000e+00> : vector<8xf32>
    %18 = vector.multi_reduction <add>, %17, %cst_11 [1] : vector<8x8xf32> to vector<8xf32>
    %19 = vector.shape_cast %18 : vector<8xf32> to vector<8x1xf32>
    %20 = arith.addf %14, %19 : vector<8x1xf32>
    %c0_12 = arith.constant 0 : index
    %c0_13 = arith.constant 0 : index
    %21 = vector.load %arg7[%c0_12, %c0_13] : memref<8x1xf32, #tpu.memory_space<vmem>>, vector<8x1xf32>
    tpu.vector_store %arg7[%c0_12, %c0_13], %20 {strides = array<i32>} : memref<8x1xf32, #tpu.memory_space<vmem>>, vector<8x1xf32>,
    %c0_14 = arith.constant 0 : index
    %c0_15 = arith.constant 0 : index
    %22 = vector.load %arg6[%c0_14, %c0_15] : memref<8x1xf32, #tpu.memory_space<vmem>>, vector<8x1xf32>
    tpu.vector_store %arg6[%c0_14, %c0_15], %9 {strides = array<i32>} : memref<8x1xf32, #tpu.memory_space<vmem>>, vector<8x1xf32>,
    %c0_i32_16 = arith.constant 0 : i32
    %23 = arith.cmpi eq, %arg1, %c0_i32_16 : i32
    %24 = arith.extui %23 : i1 to i32
    %c0_i32_17 = arith.constant 0 : i32
    %25 = arith.cmpi ne, %24, %c0_i32_17 : i32
    scf.if %25 {
      %c0_18 = arith.constant 0 : index
      %c0_19 = arith.constant 0 : index
      %26 = vector.load %arg6[%c0_18, %c0_19] : memref<8x1xf32, #tpu.memory_space<vmem>>, vector<8x1xf32>
      %c0_20 = arith.constant 0 : index
      %c0_21 = arith.constant 0 : index
      %27 = vector.load %arg7[%c0_20, %c0_21] : memref<8x1xf32, #tpu.memory_space<vmem>>, vector<8x1xf32>
      %28 = math.log %27 : vector<8x1xf32>
      %29 = arith.addf %26, %28 : vector<8x1xf32>
      %c0_22 = arith.constant 0 : index
      %c0_23 = arith.constant 0 : index
      %30 = vector.load %arg8[%c0_22, %c0_23] : memref<8x1xf32, #tpu.memory_space<vmem>>, vector<8x1xf32>
      %31 = arith.subf %29, %30 : vector<8x1xf32>
      %c0_24 = arith.constant 0 : index
      %c0_25 = arith.constant 0 : index
      %32 = vector.load %arg5[%c0_24, %c0_25] : memref<8x1xf32, #tpu.memory_space<vmem>>, vector<8x1xf32>
      tpu.vector_store %arg5[%c0_24, %c0_25], %31 {strides = array<i32>} : memref<8x1xf32, #tpu.memory_space<vmem>>, vector<8x1xf32>,
    } else {
    }
    return
  }
  func.func @transform_0(%arg0: i32, %arg1: i32) -> (i32, i32) {
    %c0_i32 = arith.constant 0 : i32
    %c0_i32_0 = arith.constant 0 : i32
    return %arg0, %c0_i32 : i32, i32
  }
  func.func @transform_1(%arg0: i32, %arg1: i32) -> (i32, i32) {
    %c0_i32 = arith.constant 0 : i32
    %c0_i32_0 = arith.constant 0 : i32
    return %arg1, %c0_i32 : i32, i32
  }
  func.func @transform_2(%arg0: i32, %arg1: i32) -> (i32, i32) {
    %c0_i32 = arith.constant 0 : i32
    %c0_i32_0 = arith.constant 0 : i32
    return %arg0, %c0_i32 : i32, i32
  }
  func.func @transform_3(%arg0: i32, %arg1: i32) -> (i32, i32) {
    %c0_i32 = arith.constant 0 : i32
    %c0_i32_0 = arith.constant 0 : i32
    return %arg0, %c0_i32 : i32, i32
  }
}

</mosaic_0001>

<bundles_post_ra>
// kernel: contrastive_pairwise_embedding_loss.1
= control target key start
LH: loop header
LB: loop body
LE: loop exit
PB: predicated region body
PF: predicated region fallthrough
CT: control target
= control target key end

     0   :  { %vm18_vm0 = vcmask 7168   ;;  %v158_v0 = vmov 0.0   ;;  %vm159_vm1 = vmmov 0   ;;  %v160_v3 = vmov -1e+30   ;;  %s202_s1 = inlined_call_operand.vmem [shape: f32[8,128], index: 1, kind: input, shape index: {}, may-alias: {1,2}]   ;;  %s203_s0 = inlined_call_operand.vmem [shape: f32[8,128], index: 0, kind: input, shape index: {}]   ;;  %s204_s2 = inlined_call_operand.vmem [shape: f32[8,128], index: 2, kind: input, shape index: {}, may-alias: {1,2}]   ;;  %s205_s3 = inlined_call_operand.vmem [shape: f32[8,1], index: 3, kind: output, shape index: {}]  }
   0x1   :  { %20 = vst.msk [vmem:[#allocation3] sm:$0xff] %vm18_vm0, %v158_v0  ;;  %142 = vmatprep.subr.mxu0 %v158_v0  ;;  %v28_v1 = vld [vmem:[%s202_s1] sm:$0xff]  ;;  %144 = vmatprep.mubr.msk.f32.mxu0 %vm159_vm1, %v158_v0  ;;  %19 = vst.msk [vmem:[#allocation2] sm:$0xff] %vm18_vm0, %v160_v3  ;;  %vm100_vm2 = vcmask 64512   ;;  %v161_v7 = vmov 0  }
   0x2   :  { %143 = vmatpush3.xpose.msra.mxu0 %v28_v1  ;;  %v27_v2 = vld [vmem:[%s203_s0] sm:$0xff]  ;;  %151 = vset.pattern.permute.xlu0 %v161_v7 }
   0x3   :  { %v22_v15 = vld [vmem:[%s204_s2] sm:$0xff] }
   0x4   :  { %v23_v18 = vmul.f32 %v27_v2, %v22_v15 }
   0x5   :  { %145 = vmatmul.mubr.f32.vlgmr.msra.gmra.mrb[0].mxu0 %v27_v2 }
   0x8   :  { %v99_v8 = vld [vmem:[#allocation2] sm:$0xff]  ;;  %v108_v21 = vld [vmem:[#allocation3] sm:$0xff] }
  0xd8   :  { %v95_v4 = vpop.f32.mrb[0].mxu0 }
  0xd9   :  { %v146_v5 = vpop.f32.mrb[1].mxu0  ;;  %v101_v6 = vsel %vm100_vm2, %v95_v4, -inf }
  0xda   :  { %102 = vmax.xlane.f32.xlu0 %v101_v6 }
 0x167   :  { %v103_v9 = vpop.xlane.xlu0 %102 }
 0x168   :  { %v104_v10 = vmax.f32 %v99_v8, %v103_v9 }
 0x16a   :  { %v105_v11 = vsub.f32 %v99_v8, %v104_v10  ;;  %124 = vst.msk [vmem:[#allocation2] sm:$0xff] %vm18_vm0, %v104_v10  ;;  %112 = vperm.xlu0 %151, %v104_v10  }
 0x16c   :  { %v106_v19 = vmul.f32 1.442695, %v105_v11 }
 0x171   :  { %v128_v29 = vld [vmem:[#allocation2] sm:$0xff] }
 0x1e9   :  { %v113_v12 = vpop.permute.xlu0 %112 }
 0x1ea   :  { %v115_v13 = vsub.f32 %v95_v4, %v113_v12 }
 0x1ec   :  { %v116_v14 = vmul.f32 1.442695, %v115_v13 }
 0x1ee   :  { %152 = vpow2.f32 %v116_v14 }
 0x1ef   :  { %154 = vpow2.f32 %v106_v19 }
 0x1f8   :  { %v153_v16 = vpop.eup %152 }
 0x1f9   :  { %v118_v17 = vsel %vm100_vm2, %v153_v16, 0.0  ;;  %v155_v20 = vpop.eup %154 }
 0x1fa   :  { %119 = vadd.xlane.f32.xlu1 %v118_v17  ;;  %v109_v22 = vmul.f32 %v155_v20, %v108_v21 }
 0x1fe   :  { %24 = vadd.xlane.f32.xlu1 %v23_v18 }
 0x287   :  { %v120_v23 = vpop.xlane.xlu1 %119 }
 0x288   :  { %v121_v24 = vadd.f32 %v120_v23, %v109_v22 }
 0x28a   :  { %123 = vst.msk [vmem:[#allocation3] sm:$0xff] %vm18_vm0, %v121_v24 }
 0x28b   :  { %v25_v25 = vpop.xlane.xlu1 %24 }
 0x28c   :  { %26 = vst.msk [vmem:[#allocation4] sm:$0xff] %vm18_vm0, %v25_v25 }
 0x291   :  { %v129_v26 = vld [vmem:[#allocation3] sm:$0xff] }
 0x292   :  { %156 = vlog2.f32 %v129_v26 }
 0x293   :  { %v133_v30 = vld [vmem:[#allocation4] sm:$0xff] }
 0x29c   :  { %v157_v27 = vpop.eup %156 }
 0x29d   :  { %v131_v28 = vmul.f32 0.6931472, %v157_v27 }
 0x29f   :  { %v132_v31 = vadd.f32 %v131_v28, %v128_v29 }
 0x2a1   :  { %v134_v32 = vsub.f32 %v132_v31, %v133_v30 }
 0x2a3   :  { %135 = vst.msk [vmem:[%s205_s3] sm:$0xff] %vm18_vm0, %v134_v32 }

</bundles_post_ra>
